<compile_context>
chip_gen: v6e
topology: v6e:2x2x1
jax: 0.10.0
libtpu: 0.0.40
codegen_flags: <defaults>
</compile_context>

<pallas_src>
import jax
import jax.numpy as jnp
from jax.experimental import pallas as pl
from jax.experimental.pallas import tpu as pltpu

_MIB = 1024 * 1024


def _round_up(x, m):
    return ((x + m - 1) // m) * m


# --------------------------------------------------------------------------- #
# Kernels
# --------------------------------------------------------------------------- #
def _linear_kernel_f32(x_ref, w_ref, b_ref, o_ref):
    """f32-output variant: accumulate directly into the resident output block.

    The output BlockSpec index is constant along the K grid axis, so o_ref is
    resident across the reduction -- no scratch accumulator needed.
    """
    k = pl.program_id(2)

    @pl.when(k == 0)
    def _init():
        o_ref[...] = jnp.zeros_like(o_ref)

    # In-kernel cast f32 -> bf16 on the VPU (hidden under MXU/DMA); avoids a
    # wrapper-side astype+pad that would re-read/re-write x in HBM.
    xt = x_ref[...].astype(w_ref.dtype)
    o_ref[...] += jnp.dot(xt, w_ref[...], preferred_element_type=jnp.float32)

    @pl.when(k == pl.num_programs(2) - 1)
    def _finalize():
        o_ref[...] += b_ref[...]          # f32 bias add (safe on v5e: no bf16 VPU)


def _linear_kernel_acc(x_ref, w_ref, b_ref, o_ref, acc_ref):
    """Narrow-output variant (e.g. bf16): f32 VMEM accumulator + cast on store."""
    k = pl.program_id(2)

    @pl.when(k == 0)
    def _init():
        acc_ref[...] = jnp.zeros_like(acc_ref)

    xt = x_ref[...].astype(w_ref.dtype)
    acc_ref[...] += jnp.dot(xt, w_ref[...], preferred_element_type=jnp.float32)

    @pl.when(k == pl.num_programs(2) - 1)
    def _finalize():
        o_ref[...] = (acc_ref[...] + b_ref[...]).astype(o_ref.dtype)


# --------------------------------------------------------------------------- #
# One-time parameter preparation (hoist this out of the per-call path)
# --------------------------------------------------------------------------- #
def prepare_linear_params(weight, bias, *, tn=512, tk=1024,
                          compute_dtype=jnp.bfloat16):
    """weight: (emb_dim, lstm_hidden)  (PyTorch nn.Linear layout); bias: (emb_dim,)

    Stores the weight persistently as a zero-padded `compute_dtype`
    [H_pad, E_pad] slab (natural [K, N] MXU rhs) and the bias as a padded f32
    row.  Do this once per model, not per forward call.
    """
    E, H = weight.shape

    E_pad = _round_up(E, 128)              # lane-dense output stores
    tn_eff = min(tn, E_pad)
    E_pad = _round_up(E_pad, tn_eff)

    H_pad = _round_up(H, 128)              # never mask the lane dim on loads
    tk_eff = min(tk, H_pad)
    H_pad = _round_up(H_pad, tk_eff)

    w_kn = jnp.zeros((H_pad, E_pad), compute_dtype)
    w_kn = w_kn.at[:H, :E].set(weight.T.astype(compute_dtype))

    b_row = jnp.zeros((1, E_pad), jnp.float32)
    b_row = b_row.at[:, :E].set(bias.astype(jnp.float32))

    return dict(w_kn=w_kn, b_row=b_row, E=E, H=H,
                E_pad=E_pad, H_pad=H_pad, tn=tn_eff, tk=tk_eff)


# --------------------------------------------------------------------------- #
# Forward
# --------------------------------------------------------------------------- #
def linear_norm_apply(x, params, *, tm=512, full_batch_tile_rows=1024,
                      vmem_budget_bytes=28 * _MIB):
    """y = x @ weight.T + bias   (torch.nn.Linear semantics).

    x: (..., lstm_hidden), consumed in its own dtype (cast happens in-kernel).
    """
    w_kn, b_row = params["w_kn"], params["b_row"]
    E, H = params["E"], params["H"]
    E_pad, H_pad = params["E_pad"], params["H_pad"]
    tn_eff, tk_eff = params["tn"], params["tk"]

    orig_shape = x.shape
    assert orig_shape[-1] == H, "input feature dim mismatch"
    out_dtype = x.dtype

    x2 = x.reshape(-1, H)
    B = x2.shape[0]

    # ---- batch tile: multiple of 16 (bf16 sublane packing).  Moderate
    # ---- batches -> one tile so the weight is streamed from HBM exactly once.
    B16 = _round_up(B, 16)
    tm_eff = B16 if B16 <= full_batch_tile_rows else _round_up(tm, 16)
    B_pad = _round_up(B, tm_eff)

    x_bytes = jnp.dtype(x2.dtype).itemsize
    w_bytes = jnp.dtype(w_kn.dtype).itemsize
    o_bytes = jnp.dtype(out_dtype).itemsize
    use_acc = out_dtype != jnp.float32

    def footprint(tm_, tk_):
        # double-buffered input/output blocks (+ f32 scratch if needed)
        return (2 * (tm_ * tk_ * x_bytes + tk_ * tn_eff * w_bytes + tn_eff * 4)
                + 2 * tm_ * tn_eff * o_bytes
                + (tm_ * tn_eff * 4 if use_acc else 0))

    # Keep the double-buffered working set inside the 32 MiB scoped VMEM
    # default (also safe on v7x's 64 MiB physical VMEM).
    while footprint(tm_eff, tk_eff) > vmem_budget_bytes:
        if tk_eff > 256 and H_pad % (tk_eff // 2) == 0:
            tk_eff //= 2
        elif tm_eff > 256:
            tm_eff = max(256, _round_up(tm_eff // 2, 16))
            B_pad = _round_up(B, tm_eff)
        else:
            break

    # Pad activations only when shapes are genuinely unaligned (no dtype cast).
    if (B_pad, H_pad) != (B, H):
        xk = jnp.zeros((B_pad, H_pad), x2.dtype).at[:B, :H].set(x2)
    else:
        xk = x2

    grid = (B_pad // tm_eff, E_pad // tn_eff, H_pad // tk_eff)

    x_spec = pl.BlockSpec((tm_eff, tk_eff), lambda i, j, k: (i, k))
    w_spec = pl.BlockSpec((tk_eff, tn_eff), lambda i, j, k: (k, j))
    # Deeper input buffering only pays when the K tile is forced small and
    # there are several K steps worth of DMA-issue latency to hide.
    if tk_eff <= 256 and grid[2] >= 3:
        x_spec = pl.BlockSpec((tm_eff, tk_eff), lambda i, j, k: (i, k),
                              pipeline_mode=pl.Buffered(3))
        w_spec = pl.BlockSpec((tk_eff, tn_eff), lambda i, j, k: (k, j),
                              pipeline_mode=pl.Buffered(3))

    if use_acc:
        kernel = _linear_kernel_acc
        scratch = [pltpu.VMEM((tm_eff, tn_eff), jnp.float32)]
    else:
        kernel = _linear_kernel_f32
        scratch = []

    cost = pl.CostEstimate(
        flops=2 * B * E * H,
        transcendentals=0,
        bytes_accessed=(B * H * x_bytes + H * E * w_bytes
                        + E * 4 + B * E * o_bytes),
    )

    out = pl.pallas_call(
        kernel,
        out_shape=jax.ShapeDtypeStruct((B_pad, E_pad), out_dtype),
        grid=grid,
        in_specs=[
            x_spec,                                              # x tile  (tm, tk)
            w_spec,                                              # w tile  (tk, tn), [K, N] layout
            pl.BlockSpec((1, tn_eff), lambda i, j, k: (0, j)),   # bias row
        ],
        out_specs=pl.BlockSpec((tm_eff, tn_eff), lambda i, j, k: (i, j)),
        scratch_shapes=scratch,
        compiler_params=pltpu.CompilerParams(
            dimension_semantics=("parallel", "parallel", "arbitrary"),
        ),
        cost_estimate=cost,
    )(xk, w_kn, b_row)

    y = out[:B, :E]
    return y.reshape(orig_shape[:-1] + (E,))


def linear_norm_forward(x, weight, bias, **kwargs):
    """Convenience wrapper matching LinearNorm.forward (prep + apply).
    In deployment call prepare_linear_params once and reuse across calls."""
    params = prepare_linear_params(weight, bias)
    return linear_norm_apply(x, params, **kwargs)


if __name__ == "__main__":
    # Small shapes consistent with the module: lstm_hidden=32, emb_dim=16, batch=8.
    lstm_hidden, emb_dim, batch = 32, 16, 8

    key = jax.random.PRNGKey(0)
    kx, kw, kb = jax.random.split(key, 3)

    # Deterministic nn.Linear-style init: U(-1/sqrt(in), 1/sqrt(in))
    bound = 1.0 / jnp.sqrt(jnp.float32(lstm_hidden))
    weight = jax.random.uniform(kw, (emb_dim, lstm_hidden), jnp.float32, -bound, bound)
    bias = jax.random.uniform(kb, (emb_dim,), jnp.float32, -bound, bound)

    x = jax.random.normal(kx, (batch, lstm_hidden), jnp.float32)

    params = prepare_linear_params(weight, bias)   # one-time, hoisted out of the hot path
    y = linear_norm_apply(x, params)
    y = jax.block_until_ready(y)

    # Correctness check vs. plain-JAX f32 reference of torch.nn.Linear.
    # bf16 MXU weight -> ~1e-2 tolerance vs. the f32 reference.
    y_ref = x @ weight.T + bias
    assert y.shape == (batch, emb_dim)
    assert jnp.allclose(y, y_ref, atol=2e-2, rtol=2e-2), "mismatch vs reference"

    print("KERNEL_OK")
</pallas_src>

<mosaic_0001>
module attributes {stable_mosaic.version = 11 : i64} {
  func.func @_linear_kernel_f32(%arg0: i32, %arg1: i32, %arg2: i32, %arg3: memref<16x128xf32, #tpu.memory_space<vmem>>, %arg4: memref<128x128xbf16, #tpu.memory_space<vmem>>, %arg5: memref<1x128xf32, #tpu.memory_space<vmem>>, %arg6: memref<16x128xf32, #tpu.memory_space<vmem>>) attributes {dimension_semantics = [#tpu.dimension_semantics<parallel>, #tpu.dimension_semantics<parallel>, #tpu.dimension_semantics<arbitrary>], iteration_bounds = array<i64: 1, 1, 1>, scalar_prefetch = 0 : i64, scratch_operands = 0 : i64, tpu.core_type = #tpu.core_type<tc>, window_params = [{transform_indices = @transform_0, window_bounds = array<i64: 16, 128>}, {transform_indices = @transform_1, window_bounds = array<i64: 128, 128>}, {transform_indices = @transform_2, window_bounds = array<i64: 1, 128>}, {transform_indices = @transform_3, window_bounds = array<i64: 16, 128>}]} {
    %c0_i32 = arith.constant 0 : i32
    %0 = arith.cmpi eq, %arg2, %c0_i32 : i32
    %1 = arith.extui %0 : i1 to i32
    %c0_i32_0 = arith.constant 0 : i32
    %2 = arith.cmpi ne, %1, %c0_i32_0 : i32
    scf.if %2 {
      %cst_10 = arith.constant 0.000000e+00 : f32
      %13 = vector.broadcast %cst_10 : f32 to vector<16x128xf32>
      %c0_11 = arith.constant 0 : index
      %c0_12 = arith.constant 0 : index
      %14 = vector.load %arg6[%c0_11, %c0_12] : memref<16x128xf32, #tpu.memory_space<vmem>>, vector<16x128xf32>
      tpu.vector_store %arg6[%c0_11, %c0_12], %13 {strides = array<i32>} : memref<16x128xf32, #tpu.memory_space<vmem>>, vector<16x128xf32>,
    } else {
    }
    %c0 = arith.constant 0 : index
    %c0_1 = arith.constant 0 : index
    %3 = vector.load %arg3[%c0, %c0_1] : memref<16x128xf32, #tpu.memory_space<vmem>>, vector<16x128xf32>
    %4 = arith.truncf %3 : vector<16x128xf32> to vector<16x128xbf16>
    %c0_2 = arith.constant 0 : index
    %c0_3 = arith.constant 0 : index
    %5 = vector.load %arg6[%c0_2, %c0_3] : memref<16x128xf32, #tpu.memory_space<vmem>>, vector<16x128xf32>
    %c0_4 = arith.constant 0 : index
    %c0_5 = arith.constant 0 : index
    %6 = vector.load %arg4[%c0_4, %c0_5] : memref<128x128xbf16, #tpu.memory_space<vmem>>, vector<128x128xbf16>
    %cst = arith.constant dense<0.000000e+00> : vector<16x128xf32>
    %7 = tpu.matmul %4, %6, %cst {dimension_numbers = #tpu.dot_dimension_numbers<[1], [0], [0], [1], [0, 0, 1, 1], [], []>} : vector<16x128xbf16>, vector<128x128xbf16>, vector<16x128xf32> -> vector<16x128xf32>
    %8 = arith.addf %5, %7 : vector<16x128xf32>
    %c0_6 = arith.constant 0 : index
    %c0_7 = arith.constant 0 : index
    %9 = vector.load %arg6[%c0_6, %c0_7] : memref<16x128xf32, #tpu.memory_space<vmem>>, vector<16x128xf32>
    tpu.vector_store %arg6[%c0_6, %c0_7], %8 {strides = array<i32>} : memref<16x128xf32, #tpu.memory_space<vmem>>, vector<16x128xf32>,
    %c0_i32_8 = arith.constant 0 : i32
    %10 = arith.cmpi eq, %arg2, %c0_i32_8 : i32
    %11 = arith.extui %10 : i1 to i32
    %c0_i32_9 = arith.constant 0 : i32
    %12 = arith.cmpi ne, %11, %c0_i32_9 : i32
    scf.if %12 {
      %c0_10 = arith.constant 0 : index
      %c0_11 = arith.constant 0 : index
      %13 = vector.load %arg6[%c0_10, %c0_11] : memref<16x128xf32, #tpu.memory_space<vmem>>, vector<16x128xf32>
      %c0_12 = arith.constant 0 : index
      %c0_13 = arith.constant 0 : index
      %14 = vector.load %arg5[%c0_12, %c0_13] : memref<1x128xf32, #tpu.memory_space<vmem>>, vector<1x128xf32>
      %15 = vector.broadcast %14 : vector<1x128xf32> to vector<16x128xf32>
      %16 = arith.addf %13, %15 : vector<16x128xf32>
      %c0_14 = arith.constant 0 : index
      %c0_15 = arith.constant 0 : index
      %17 = vector.load %arg6[%c0_14, %c0_15] : memref<16x128xf32, #tpu.memory_space<vmem>>, vector<16x128xf32>
      tpu.vector_store %arg6[%c0_14, %c0_15], %16 {strides = array<i32>} : memref<16x128xf32, #tpu.memory_space<vmem>>, vector<16x128xf32>,
    } else {
    }
    return
  }
  func.func @transform_0(%arg0: i32, %arg1: i32, %arg2: i32) -> (i32, i32) {
    %c0_i32 = arith.constant 0 : i32
    return %arg0, %arg2 : i32, i32
  }
  func.func @transform_1(%arg0: i32, %arg1: i32, %arg2: i32) -> (i32, i32) {
    %c0_i32 = arith.constant 0 : i32
    return %arg2, %arg1 : i32, i32
  }
  func.func @transform_2(%arg0: i32, %arg1: i32, %arg2: i32) -> (i32, i32) {
    %c0_i32 = arith.constant 0 : i32
    %c0_i32_0 = arith.constant 0 : i32
    return %c0_i32, %arg1 : i32, i32
  }
  func.func @transform_3(%arg0: i32, %arg1: i32, %arg2: i32) -> (i32, i32) {
    %c0_i32 = arith.constant 0 : i32
    return %arg0, %arg1 : i32, i32
  }
}

</mosaic_0001>

<bundles_post_ra>
// kernel: tpu_custom_call.1
= control target key start
LH: loop header
LB: loop body
LE: loop exit
PB: predicated region body
PF: predicated region fallthrough
CT: control target
= control target key end

     0   :  { %8 = vsyncpa [#allocation3], 0  ;;  %s366_s0 = inlined_call_operand.hbm [shape: f32[16,128], index: 0, kind: input, shape index: {}]   ;;  %s367_s1 = inlined_call_operand.hbm [shape: bf16[128,128], index: 1, kind: input, shape index: {}]   ;;  %s368_s2 = inlined_call_operand.vmem [shape: f32[1,128], index: 2, kind: input, shape index: {}]   ;;  %s369_s3 = inlined_call_operand.hbm [shape: f32[16,128], index: 3, kind: output, shape index: {}]  }
   0x1   :  { %9 = vsyncpa [#allocation6], 0 }
   0x2   :  { %10 = vsyncpa [#allocation4], 0  ;;  %s319_s12 = smov [#allocation2]  }
   0x3   :  { %s16_s13 = sshll.u32 %s319_s12, 4  ;;  %s17_s13 = int_to_ptr.vmem [resolvable:$true] %s16_s13 }
   0x4   :  { %s261_s14 = scalar_lea.vmem %s17_s13, 256  ;;  %p266_p1 = scmp.lt.s32.totalorder %s17_s13, %s17_s13 }
   0x5   :  { %p262_p0 = scmp.ne.s32.totalorder %s17_s13, %s261_s14  ;;  %p267_p2 = scmp.lt.s32.totalorder %s261_s14, %s261_s14 }
   0x7   :  { %p268_p3 = por %p267_p2, %p266_p1 }
   0x9   :  { %p269_p4 = pnand %p268_p3, %p262_p0 }
   0xb   :  { %272 = shalt.err (!%p269_p4)
}
   0xc   :  { %s320_s15 = smov 128   ;;  %s321_s16 = smov 8  }
   0xd   :  { %22 = dma.hbm_to_vmem [thread:$0]  %s366_s0, 256, %s17_s13, [#allocation3], %s320_s15, %s320_s15, %s321_s16  }
   0xe   :  { %s322_s19 = smov [#allocation5]  }
   0xf   :  { %s28_s20 = sshll.u32 %s322_s19, 4  ;;  %s29_s20 = int_to_ptr.vmem [resolvable:$true] %s28_s20 }
  0x10   :  { %s281_s21 = scalar_lea.vmem %s29_s20, 1024  ;;  %p286_p6 = scmp.lt.s32.totalorder %s29_s20, %s29_s20 }
  0x11   :  { %p282_p5 = scmp.ne.s32.totalorder %s29_s20, %s281_s21  ;;  %p287_p7 = scmp.lt.s32.totalorder %s281_s21, %s281_s21 }
  0x13   :  { %p288_p8 = por %p287_p7, %p286_p6 }
  0x15   :  { %p289_p9 = pnand %p288_p8, %p282_p5 }
  0x17   :  { %292 = shalt.err (!%p289_p9)
}
  0x18   :  { %s323_s22 = smov 64   ;;  %s324_s23 = smov 4  }
  0x19   :  { %34 = dma.hbm_to_vmem [thread:$0]  %s367_s1, 1024, %s29_s20, [#allocation6], %s323_s22, %s323_s22, %s324_s23  }
  0x1a   :  { %313 = dma.done.wait [#allocation3], 256  }
  0x1b   :  { %314 = vsyncadd [#allocation3], 4294967040 }
  0x1c   :  { %315 = dma.done.wait [#allocation6], 1024  }
  0x1d   :  { %316 = vsyncadd [#allocation6], 4294966272  ;;  %v325_v0 = vmov 0.0   ;;  %vm326_vm0 = vmmov 0   ;;  %v245_v1 = vld [vmem:[#allocation5 + $0x38] sm:$0xff]   ;;  %v246_v2 = vld [vmem:[#allocation5 + $0x30] sm:$0xff]  }
  0x1e   :  { %216 = vmatprep.subr.bf16.mxu0 %v325_v0  ;;  %232 = vmatprep.mubr.msk.bf16.mxu0 %vm326_vm0, %v325_v0  ;;  %v247_v3 = vld [vmem:[#allocation5 + $0x28] sm:$0xff]   ;;  %v248_v4 = vld [vmem:[#allocation5 + $0x20] sm:$0xff]   ;;  %v249_v5 = vld [vmem:[#allocation5 + $0x18] sm:$0xff]   ;;  %s327_s26 = smov [#allocation7]  }
  0x1f   :  { %217 = vmatpush3.bf16.msra.mxu0 %v245_v1  ;;  %v250_v6 = vld [vmem:[#allocation5 + $0x10] sm:$0xff]   ;;  %v251_v7 = vld [vmem:[#allocation5 + $0x8] sm:$0xff]   ;;  %v252_v8 = vld [vmem:[#allocation5] sm:$0xff]   ;;  %s185_s27 = sshll.u32 %s327_s26, 4  ;;  %s186_s27 = int_to_ptr.vmem [resolvable:$true] %s185_s27 }
  0x20   :  { %218 = vmatprep.subr.bf16.mxu0 %v325_v0  ;;  %v50_v9 = vld [vmem:[#allocation2] sm:$0xff]  ;;  %v51_v10 = vld [vmem:[#allocation2 + $0x8] sm:$0xff]  ;;  %s293_s28 = scalar_lea.vmem %s186_s27, 256  ;;  %p298_p11 = scmp.lt.s32.totalorder %s186_s27, %s186_s27 }
  0x21   :  { %v52_v11 = vpack.c.bf16 %v51_v10, %v50_v9  ;;  %v206_v13 = vld [vmem:[%s368_s2] ss:$0 sm:$0xff]  ;;  %p294_p10 = scmp.ne.s32.totalorder %s186_s27, %s293_s28  ;;  %p299_p12 = scmp.lt.s32.totalorder %s293_s28, %s293_s28 }
  0x23   :  { %219 = vmatpush3.bf16.msra.mxu0 %v246_v2  ;;  %p300_p13 = por %p299_p12, %p298_p11 }
  0x24   :  { %220 = vmatprep.subr.bf16.mxu0 %v325_v0 }
  0x25   :  { %p301_p0 = pnand %p300_p13, %p294_p10 }
  0x27   :  { %221 = vmatpush3.bf16.msra.mxu0 %v247_v3 }
  0x28   :  { %222 = vmatprep.subr.bf16.mxu0 %v325_v0 }
  0x2b   :  { %223 = vmatpush3.bf16.msra.mxu0 %v248_v4 }
  0x2c   :  { %224 = vmatprep.subr.bf16.mxu0 %v325_v0 }
  0x2f   :  { %225 = vmatpush3.bf16.msra.mxu0 %v249_v5 }
  0x30   :  { %226 = vmatprep.subr.bf16.mxu0 %v325_v0 }
  0x33   :  { %227 = vmatpush3.bf16.msra.mxu0 %v250_v6 }
  0x34   :  { %228 = vmatprep.subr.bf16.mxu0 %v325_v0 }
  0x37   :  { %229 = vmatpush3.bf16.msra.mxu0 %v251_v7 }
  0x38   :  { %230 = vmatprep.subr.bf16.mxu0 %v325_v0 }
  0x3b   :  { %231 = vmatpush3.bf16.msra.mxu0 %v252_v8 }
  0x3e   :  { %233 = vmatmul.mubr.bf16.vlgmr.msra.gmra.mxu0 %v52_v11 }
  0xfe   :  { %v153_v12 = vpop.f32.mrf.mxu0 }
  0xff   :  { %v176_v15 = vadd.f32 %v206_v13, %v153_v12 }
 0x100   :  { %v234_v14 = vpop.f32.mrf.mxu0 }
 0x101   :  { %178 = vst [vmem:[#allocation7] sm:$0xff] %v176_v15 }
 0x102   :  { %v156_v16 = vpop.f32.mrf.mxu0 }
 0x103   :  { %v177_v18 = vadd.f32 %v206_v13, %v156_v16 }
 0x104   :  { %v235_v17 = vpop.f32.mrf.mxu0 }
 0x105   :  { %179 = vst [vmem:[#allocation7 + $0x8] sm:$0xff] %v177_v18 }
 0x106   :  { %304 = shalt.err (!%p301_p0)
}
 0x107   :  { %191 = dma.vmem_to_hbm [thread:$0]  %s186_s27, 256, %s369_s3, [#allocation4], %s320_s15, %s320_s15, %s321_s16  }
 0x108   :  { %317 = dma.done.wait [#allocation4], 256  }
 0x109   :  { %318 = vsyncadd [#allocation4], 4294967040 }
 0x10a   :  { %195 = vsyncpa [#allocation3], 1 }
 0x10b   :  { %196 = vsyncpa [#allocation6], 1 }
 0x10c   :  { %197 = vsyncpa [#allocation4], 1 }

</bundles_post_ra>
